<compile_context>
chip_gen: v5e
topology: v5e:2x2
jax: 0.10.0
libtpu: 0.0.40
codegen_flags: <defaults>
</compile_context>

<pallas_src>
import functools

import jax
import jax.numpy as jnp
from jax.experimental import pallas as pl
from jax.experimental.pallas import tpu as pltpu

IN_FEATURES = 32 * 32 * 3      # 3072, matches torch x.view(B, -1) on (B, 3, 32, 32)
HIDDEN = 128
NUM_CLASSES = 10
PADDED_OUT = 128               # lane-dense output width; logits = [:, :10]


def _round_up(n, m):
    return pl.cdiv(n, m) * m


def mlp_kernel(x_ref, w1_ref, b1_ref, w2_ref, b2_ref,
               w3_ref, b3_ref, w4_ref, b4_ref, o_ref):
    # x tile: (TM, 3072) f32 streamed from HBM; cast to bf16 in-kernel so the
    # wrapper never materializes a bf16 copy of x. Weights bf16 VMEM-resident;
    # biases f32 (added after f32 accumulation). Whole forward fused per tile.
    x = x_ref[...].astype(jnp.bfloat16)
    h = jnp.dot(x, w1_ref[...], preferred_element_type=jnp.float32) + b1_ref[...]
    h = jnp.maximum(h, 0.0).astype(jnp.bfloat16)
    h = jnp.dot(h, w2_ref[...], preferred_element_type=jnp.float32) + b2_ref[...]
    h = jnp.maximum(h, 0.0).astype(jnp.bfloat16)
    h = jnp.dot(h, w3_ref[...], preferred_element_type=jnp.float32) + b3_ref[...]
    h = jnp.maximum(h, 0.0).astype(jnp.bfloat16)
    out = jnp.dot(h, w4_ref[...], preferred_element_type=jnp.float32) + b4_ref[...]
    o_ref[...] = out.astype(o_ref.dtype)   # (TM, 128) lane-dense bf16 store


def prepare_params(params):
    """One-time weight prep: bf16 weights, f32 biases, w4/b4 padded 10->128.

    Call this ONCE and reuse the result across mlp_forward calls so the per-call
    weight cast/pad (~2.4 MB of HBM traffic) isn't repeated.
    """
    (w1, b1), (w2, b2), (w3, b3), (w4, b4) = params
    w4p = jnp.pad(w4, ((0, 0), (0, PADDED_OUT - NUM_CLASSES)))
    b4p = jnp.pad(b4, ((0, 0), (0, PADDED_OUT - NUM_CLASSES)))
    return (w1.astype(jnp.bfloat16), b1.astype(jnp.float32),
            w2.astype(jnp.bfloat16), b2.astype(jnp.float32),
            w3.astype(jnp.bfloat16), b3.astype(jnp.float32),
            w4p.astype(jnp.bfloat16), b4p.astype(jnp.float32))


def mlp_forward(x, prepared_params, *, tm=512):
    """x: (B, 3, 32, 32) float32. prepared_params: from prepare_params().

    Returns logits (B, 10) float32.
    """
    B = x.shape[0]
    x_flat = x.reshape(B, -1)                      # free metadata reshape, stays f32

    # Batch tile: multiple of 8 sublanes. Cap so the grid has >=2 steps whenever
    # B >= 16 (keeps both v7x TensorCores busy via the "parallel" axis); never
    # over-pad tiny batches.
    tm = max(8, min(tm, _round_up(pl.cdiv(B, 2), 8)))
    grid = (pl.cdiv(B, tm),)                       # partial last block handled by Pallas

    w1, b1, w2, b2, w3, b3, w4, b4 = prepared_params

    weight_bytes = ((w1.size + w2.size + w3.size + w4.size) * 2
                    + (b1.size + b2.size + b3.size + b4.size) * 4)
    cost = pl.CostEstimate(
        flops=2 * B * (IN_FEATURES * HIDDEN + 2 * HIDDEN * HIDDEN
                       + HIDDEN * PADDED_OUT),
        bytes_accessed=B * IN_FEATURES * 4 + weight_bytes + B * PADDED_OUT * 2,
        transcendentals=0,
    )

    # Explicit VMEM budget: double-buffered f32 x tiles + bf16 out tiles +
    # resident weights + headroom. Raises v5e's 16 MiB default scope; stays far
    # under v7x's 64 MiB physical VMEM at the default tm=512 (~17 MiB total).
    vmem_limit = (2 * tm * IN_FEATURES * 4
                  + 2 * tm * PADDED_OUT * 2
                  + 2 * weight_bytes
                  + (2 << 20))
    vmem_limit = int(min(max(vmem_limit, 16 << 20), 56 << 20))

    const = lambda i: (0, 0)
    out_padded = pl.pallas_call(
        mlp_kernel,
        out_shape=jax.ShapeDtypeStruct((B, PADDED_OUT), jnp.bfloat16),
        grid_spec=pltpu.PrefetchScalarGridSpec(
            num_scalar_prefetch=0,
            grid=grid,
            in_specs=[
                pl.BlockSpec((tm, IN_FEATURES), lambda i: (i, 0)),  # streamed f32 x tile
                pl.BlockSpec((IN_FEATURES, HIDDEN), const),         # resident weights
                pl.BlockSpec((1, HIDDEN), const),
                pl.BlockSpec((HIDDEN, HIDDEN), const),
                pl.BlockSpec((1, HIDDEN), const),
                pl.BlockSpec((HIDDEN, HIDDEN), const),
                pl.BlockSpec((1, HIDDEN), const),
                pl.BlockSpec((HIDDEN, PADDED_OUT), const),
                pl.BlockSpec((1, PADDED_OUT), const),
            ],
            out_specs=pl.BlockSpec((tm, PADDED_OUT), lambda i: (i, 0)),
        ),
        compiler_params=pltpu.CompilerParams(
            dimension_semantics=("parallel",),   # shard batch tiles across TCs (v7x)
            vmem_limit_bytes=vmem_limit,
        ),
        cost_estimate=cost,
    )(x_flat, w1, b1, w2, b2, w3, b3, w4, b4)

    return out_padded[:, :NUM_CLASSES].astype(jnp.float32)


def init_params(key):
    """Synthetic init mirroring nn.Linear shapes; weights stored as (in, out)."""
    dims = [(IN_FEATURES, HIDDEN), (HIDDEN, HIDDEN), (HIDDEN, HIDDEN),
            (HIDDEN, NUM_CLASSES)]
    params = []
    for (fan_in, fan_out) in dims:
        key, kw, kb = jax.random.split(key, 3)
        bound = 1.0 / jnp.sqrt(fan_in)
        w = jax.random.uniform(kw, (fan_in, fan_out), jnp.float32, -bound, bound)
        b = jax.random.uniform(kb, (1, fan_out), jnp.float32, -bound, bound)
        params.append((w, b))
    return params


def mlp_reference(x, params):
    """Plain-JAX reference mirroring the kernel's bf16/f32-accum arithmetic
    (including the bf16 output store), returned as f32."""
    h = x.reshape(x.shape[0], -1).astype(jnp.bfloat16)
    (w1, b1), (w2, b2), (w3, b3), (w4, b4) = params

    def layer(h, w, b, relu):
        y = jnp.dot(h, w.astype(jnp.bfloat16),
                    preferred_element_type=jnp.float32) + b
        return jnp.maximum(y, 0.0).astype(jnp.bfloat16) if relu else y

    h = layer(h, w1, b1, True)
    h = layer(h, w2, b2, True)
    h = layer(h, w3, b3, True)
    out = layer(h, w4, b4, False)
    return out.astype(jnp.bfloat16).astype(jnp.float32)


if __name__ == "__main__":
    key = jax.random.PRNGKey(0)
    key, kx = jax.random.split(key)
    # Input implied by fc1: 32*32*3 features -> NCHW (B, 3, 32, 32)
    x = jax.random.normal(kx, (2, 3, 32, 32), dtype=jnp.float32)
    params = init_params(key)
    prepared = prepare_params(params)       # one-time weight prep (cached by caller)

    out = mlp_forward(x, prepared)
    out = jax.block_until_ready(out)

    ref = mlp_reference(x, params)
    assert out.shape == (2, 10)
    assert jnp.allclose(out, ref, atol=1e-2, rtol=1e-2), (
        f"max abs err {jnp.max(jnp.abs(out - ref))}")
    print("KERNEL_OK")
</pallas_src>

<mosaic_0001>
module attributes {stable_mosaic.version = 11 : i64} {
  func.func @mlp_kernel(%arg0: i32, %arg1: memref<8x3072xf32, #tpu.memory_space<vmem>>, %arg2: memref<3072x128xbf16, #tpu.memory_space<vmem>>, %arg3: memref<1x128xf32, #tpu.memory_space<vmem>>, %arg4: memref<128x128xbf16, #tpu.memory_space<vmem>>, %arg5: memref<1x128xf32, #tpu.memory_space<vmem>>, %arg6: memref<128x128xbf16, #tpu.memory_space<vmem>>, %arg7: memref<1x128xf32, #tpu.memory_space<vmem>>, %arg8: memref<128x128xbf16, #tpu.memory_space<vmem>>, %arg9: memref<1x128xf32, #tpu.memory_space<vmem>>, %arg10: memref<8x128xbf16, #tpu.memory_space<vmem>>) attributes {dimension_semantics = [#tpu.dimension_semantics<parallel>], iteration_bounds = array<i64: 1>, scalar_prefetch = 0 : i64, scratch_operands = 0 : i64, tpu.core_type = #tpu.core_type<tc>, window_params = [{transform_indices = @transform_0, window_bounds = array<i64: 8, 3072>}, {pipeline_mode = #tpu.pipeline_mode<synchronous>, transform_indices = @transform_1, window_bounds = array<i64: 3072, 128>}, {pipeline_mode = #tpu.pipeline_mode<synchronous>, transform_indices = @transform_2, window_bounds = array<i64: 1, 128>}, {pipeline_mode = #tpu.pipeline_mode<synchronous>, transform_indices = @transform_3, window_bounds = array<i64: 128, 128>}, {pipeline_mode = #tpu.pipeline_mode<synchronous>, transform_indices = @transform_4, window_bounds = array<i64: 1, 128>}, {pipeline_mode = #tpu.pipeline_mode<synchronous>, transform_indices = @transform_5, window_bounds = array<i64: 128, 128>}, {pipeline_mode = #tpu.pipeline_mode<synchronous>, transform_indices = @transform_6, window_bounds = array<i64: 1, 128>}, {pipeline_mode = #tpu.pipeline_mode<synchronous>, transform_indices = @transform_7, window_bounds = array<i64: 128, 128>}, {pipeline_mode = #tpu.pipeline_mode<synchronous>, transform_indices = @transform_8, window_bounds = array<i64: 1, 128>}, {transform_indices = @transform_9, window_bounds = array<i64: 8, 128>}]} {
    %c0 = arith.constant 0 : index
    %c0_0 = arith.constant 0 : index
    %0 = vector.load %arg1[%c0, %c0_0] : memref<8x3072xf32, #tpu.memory_space<vmem>>, vector<8x3072xf32>
    %1 = arith.truncf %0 : vector<8x3072xf32> to vector<8x3072xbf16>
    %c0_1 = arith.constant 0 : index
    %c0_2 = arith.constant 0 : index
    %2 = vector.load %arg2[%c0_1, %c0_2] : memref<3072x128xbf16, #tpu.memory_space<vmem>>, vector<3072x128xbf16>
    %cst = arith.constant dense<0.000000e+00> : vector<8x128xf32>
    %3 = tpu.matmul %1, %2, %cst {dimension_numbers = #tpu.dot_dimension_numbers<[1], [0], [0], [1], [0, 0, 1, 1], [], []>} : vector<8x3072xbf16>, vector<3072x128xbf16>, vector<8x128xf32> -> vector<8x128xf32>
    %c0_3 = arith.constant 0 : index
    %c0_4 = arith.constant 0 : index
    %4 = vector.load %arg3[%c0_3, %c0_4] : memref<1x128xf32, #tpu.memory_space<vmem>>, vector<1x128xf32>
    %5 = vector.broadcast %4 : vector<1x128xf32> to vector<8x128xf32>
    %6 = arith.addf %3, %5 : vector<8x128xf32>
    %cst_5 = arith.constant 0.000000e+00 : f32
    %7 = vector.broadcast %cst_5 : f32 to vector<8x128xf32>
    %8 = arith.maximumf %6, %7 : vector<8x128xf32>
    %9 = arith.truncf %8 : vector<8x128xf32> to vector<8x128xbf16>
    %c0_6 = arith.constant 0 : index
    %c0_7 = arith.constant 0 : index
    %10 = vector.load %arg4[%c0_6, %c0_7] : memref<128x128xbf16, #tpu.memory_space<vmem>>, vector<128x128xbf16>
    %cst_8 = arith.constant dense<0.000000e+00> : vector<8x128xf32>
    %11 = tpu.matmul %9, %10, %cst_8 {dimension_numbers = #tpu.dot_dimension_numbers<[1], [0], [0], [1], [0, 0, 1, 1], [], []>} : vector<8x128xbf16>, vector<128x128xbf16>, vector<8x128xf32> -> vector<8x128xf32>
    %c0_9 = arith.constant 0 : index
    %c0_10 = arith.constant 0 : index
    %12 = vector.load %arg5[%c0_9, %c0_10] : memref<1x128xf32, #tpu.memory_space<vmem>>, vector<1x128xf32>
    %13 = vector.broadcast %12 : vector<1x128xf32> to vector<8x128xf32>
    %14 = arith.addf %11, %13 : vector<8x128xf32>
    %cst_11 = arith.constant 0.000000e+00 : f32
    %15 = vector.broadcast %cst_11 : f32 to vector<8x128xf32>
    %16 = arith.maximumf %14, %15 : vector<8x128xf32>
    %17 = arith.truncf %16 : vector<8x128xf32> to vector<8x128xbf16>
    %c0_12 = arith.constant 0 : index
    %c0_13 = arith.constant 0 : index
    %18 = vector.load %arg6[%c0_12, %c0_13] : memref<128x128xbf16, #tpu.memory_space<vmem>>, vector<128x128xbf16>
    %cst_14 = arith.constant dense<0.000000e+00> : vector<8x128xf32>
    %19 = tpu.matmul %17, %18, %cst_14 {dimension_numbers = #tpu.dot_dimension_numbers<[1], [0], [0], [1], [0, 0, 1, 1], [], []>} : vector<8x128xbf16>, vector<128x128xbf16>, vector<8x128xf32> -> vector<8x128xf32>
    %c0_15 = arith.constant 0 : index
    %c0_16 = arith.constant 0 : index
    %20 = vector.load %arg7[%c0_15, %c0_16] : memref<1x128xf32, #tpu.memory_space<vmem>>, vector<1x128xf32>
    %21 = vector.broadcast %20 : vector<1x128xf32> to vector<8x128xf32>
    %22 = arith.addf %19, %21 : vector<8x128xf32>
    %cst_17 = arith.constant 0.000000e+00 : f32
    %23 = vector.broadcast %cst_17 : f32 to vector<8x128xf32>
    %24 = arith.maximumf %22, %23 : vector<8x128xf32>
    %25 = arith.truncf %24 : vector<8x128xf32> to vector<8x128xbf16>
    %c0_18 = arith.constant 0 : index
    %c0_19 = arith.constant 0 : index
    %26 = vector.load %arg8[%c0_18, %c0_19] : memref<128x128xbf16, #tpu.memory_space<vmem>>, vector<128x128xbf16>
    %cst_20 = arith.constant dense<0.000000e+00> : vector<8x128xf32>
    %27 = tpu.matmul %25, %26, %cst_20 {dimension_numbers = #tpu.dot_dimension_numbers<[1], [0], [0], [1], [0, 0, 1, 1], [], []>} : vector<8x128xbf16>, vector<128x128xbf16>, vector<8x128xf32> -> vector<8x128xf32>
    %c0_21 = arith.constant 0 : index
    %c0_22 = arith.constant 0 : index
    %28 = vector.load %arg9[%c0_21, %c0_22] : memref<1x128xf32, #tpu.memory_space<vmem>>, vector<1x128xf32>
    %29 = vector.broadcast %28 : vector<1x128xf32> to vector<8x128xf32>
    %30 = arith.addf %27, %29 : vector<8x128xf32>
    %31 = arith.truncf %30 : vector<8x128xf32> to vector<8x128xbf16>
    %c0_23 = arith.constant 0 : index
    %c0_24 = arith.constant 0 : index
    %32 = vector.load %arg10[%c0_23, %c0_24] : memref<8x128xbf16, #tpu.memory_space<vmem>>, vector<8x128xbf16>
    tpu.vector_store %arg10[%c0_23, %c0_24], %31 {strides = array<i32>} : memref<8x128xbf16, #tpu.memory_space<vmem>>, vector<8x128xbf16>,
    return
  }
  func.func @transform_0(%arg0: i32) -> (i32, i32) {
    %c0_i32 = arith.constant 0 : i32
    %c0_i32_0 = arith.constant 0 : i32
    return %arg0, %c0_i32 : i32, i32
  }
  func.func @transform_1(%arg0: i32) -> (i32, i32) {
    %c0_i32 = arith.constant 0 : i32
    %c0_i32_0 = arith.constant 0 : i32
    %c0_i32_1 = arith.constant 0 : i32
    return %c0_i32, %c0_i32_0 : i32, i32
  }
  func.func @transform_2(%arg0: i32) -> (i32, i32) {
    %c0_i32 = arith.constant 0 : i32
    %c0_i32_0 = arith.constant 0 : i32
    %c0_i32_1 = arith.constant 0 : i32
    return %c0_i32, %c0_i32_0 : i32, i32
  }
  func.func @transform_3(%arg0: i32) -> (i32, i32) {
    %c0_i32 = arith.constant 0 : i32
    %c0_i32_0 = arith.constant 0 : i32
    %c0_i32_1 = arith.constant 0 : i32
    return %c0_i32, %c0_i32_0 : i32, i32
  }
  func.func @transform_4(%arg0: i32) -> (i32, i32) {
    %c0_i32 = arith.constant 0 : i32
    %c0_i32_0 = arith.constant 0 : i32
    %c0_i32_1 = arith.constant 0 : i32
    return %c0_i32, %c0_i32_0 : i32, i32
  }
  func.func @transform_5(%arg0: i32) -> (i32, i32) {
    %c0_i32 = arith.constant 0 : i32
    %c0_i32_0 = arith.constant 0 : i32
    %c0_i32_1 = arith.constant 0 : i32
    return %c0_i32, %c0_i32_0 : i32, i32
  }
  func.func @transform_6(%arg0: i32) -> (i32, i32) {
    %c0_i32 = arith.constant 0 : i32
    %c0_i32_0 = arith.constant 0 : i32
    %c0_i32_1 = arith.constant 0 : i32
    return %c0_i32, %c0_i32_0 : i32, i32
  }
  func.func @transform_7(%arg0: i32) -> (i32, i32) {
    %c0_i32 = arith.constant 0 : i32
    %c0_i32_0 = arith.constant 0 : i32
    %c0_i32_1 = arith.constant 0 : i32
    return %c0_i32, %c0_i32_0 : i32, i32
  }
  func.func @transform_8(%arg0: i32) -> (i32, i32) {
    %c0_i32 = arith.constant 0 : i32
    %c0_i32_0 = arith.constant 0 : i32
    %c0_i32_1 = arith.constant 0 : i32
    return %c0_i32, %c0_i32_0 : i32, i32
  }
  func.func @transform_9(%arg0: i32) -> (i32, i32) {
    %c0_i32 = arith.constant 0 : i32
    %c0_i32_0 = arith.constant 0 : i32
    return %arg0, %c0_i32 : i32, i32
  }
}

</mosaic_0001>

<bundles_post_ra>
// kernel: tpu_custom_call.1
= control target key start
LH: loop header
LB: loop body
LE: loop exit
PB: predicated region body
PF: predicated region fallthrough
CT: control target
= control target key end

     0   :  { %14 = vsyncpa [#allocation3], 0  ;;  %s3763_s0 = inlined_call_operand.hbm [shape: f32[2,3072], index: 0, kind: input, shape index: {}]   ;;  %s3764_s1 = inlined_call_operand.hbm [shape: bf16[3072,128], index: 1, kind: input, shape index: {}]   ;;  %s3765_s2 = inlined_call_operand.vmem [shape: f32[1,128], index: 2, kind: input, shape index: {}]   ;;  %s3766_s3 = inlined_call_operand.hbm [shape: bf16[128,128], index: 3, kind: input, shape index: {}]   ;;  %s3767_s4 = inlined_call_operand.vmem [shape: f32[1,128], index: 4, kind: input, shape index: {}]   ;;  %s3768_s5 = inlined_call_operand.hbm [shape: bf16[128,128], index: 5, kind: input, shape index: {}]   ;;  %s3769_s6 = inlined_call_operand.vmem [shape: f32[1,128], index: 6, kind: input, shape index: {}]   ;;  %s3770_s7 = inlined_call_operand.hbm [shape: bf16[128,128], index: 7, kind: input, shape index: {}]   ;;  %s3771_s8 = inlined_call_operand.vmem [shape: f32[1,128], index: 8, kind: input, shape index: {}]   ;;  %s3772_s9 = inlined_call_operand.hbm [shape: bf16[2,128], index: 9, kind: output, shape index: {}]  }
   0x1   :  { %15 = vsyncpa [#allocation6], 0 }
   0x2   :  { %16 = vsyncpa [#allocation9], 0 }
   0x3   :  { %17 = vsyncpa [#allocation4], 0  ;;  %s35_s11 = sshll.u32 %s3764_s1, 4  ;;  %s36_s11 = int_to_ptr.hbm [resolvable:$true] %s35_s11 }
   0x4   :  { %21 = vsyncadd [#allocation3], 2304  ;;  %s3659_s12 = smov [#allocation5]   ;;  %s65_s16 = sshll.u32 %s3768_s5, 4  ;;  %s66_s16 = int_to_ptr.hbm [resolvable:$true] %s65_s16 }
   0x5   :  { %s37_s13 = sshll.u32 %s3659_s12, 4  ;;  %s3660_s17 = smov 64   ;;  %s38_s13 = int_to_ptr.vmem [resolvable:$true] %s37_s13 }
   0x6   :  { %s3661_s18 = smov 4   ;;  %s3662_s19 = smov [#allocation8]  }
   0x7   :  { %43 = dma.hbm_to_vmem [thread:$0]  %s36_s11, 24576, %s38_s13, [#allocation6], %s3660_s17, %s3660_s17, %s3661_s18  }
   0x8   :  { %s67_s20 = sshll.u32 %s3662_s19, 4  ;;  %s22_s22 = sshll.u32 %s3763_s0, 4  ;;  %s68_s20 = int_to_ptr.vmem [resolvable:$true] %s67_s20  ;;  %s23_s22 = int_to_ptr.hbm [resolvable:$true] %s22_s22 }
   0x9   :  { %73 = dma.hbm_to_vmem [thread:$0]  %s66_s16, 1024, %s68_s20, [#allocation9], %s3660_s17, %s3660_s17, %s3661_s18  }
   0xa   :  { %s3663_s5 = smov [#allocation2]   ;;  %s50_s26 = sshll.u32 %s3766_s3, 4  ;;  %s51_s26 = int_to_ptr.hbm [resolvable:$true] %s50_s26 }
   0xb   :  { %s24_s23 = sshll.u32 %s3663_s5, 4  ;;  %s3664_s27 = smov 768   ;;  %s25_s23 = int_to_ptr.vmem [resolvable:$true] %s24_s23 }
   0xc   :  { %s3665_s28 = smov 48   ;;  %s3666_s29 = smov [#allocation7]  }
   0xd   :  { %30 = dma.hbm_to_vmem [thread:$0]  %s23_s22, 768, %s25_s23, [#allocation3], %s3664_s27, %s3664_s27, %s3665_s28  }
   0xe   :  { %s52_s30 = sshll.u32 %s3666_s29, 4  ;;  %s80_s11 = sshll.u32 %s3770_s7, 4  ;;  %s53_s30 = int_to_ptr.vmem [resolvable:$true] %s52_s30  ;;  %s81_s11 = int_to_ptr.hbm [resolvable:$true] %s80_s11 }
   0xf   :  { %58 = dma.hbm_to_vmem [thread:$0]  %s51_s26, 1024, %s53_s30, [#allocation6], %s3660_s17, %s3660_s17, %s3661_s18  }
  0x10   :  { %s3667_s12 = smov [#allocation10]  }
  0x11   :  { %s82_s13 = sshll.u32 %s3667_s12, 4  ;;  %s83_s13 = int_to_ptr.vmem [resolvable:$true] %s82_s13 }
  0x12   :  { %88 = dma.hbm_to_vmem [thread:$0]  %s81_s11, 1024, %s83_s13, [#allocation9], %s3660_s17, %s3660_s17, %s3661_s18  }
  0x13   :  { %3651 = dma.done.wait [#allocation3], 3072  }
  0x14   :  { %3652 = vsyncadd [#allocation3], 4294964224 }
  0x15   :  { %3653 = dma.done.wait [#allocation6], 25600  }
  0x16   :  { %3654 = vsyncadd [#allocation6], 4294941696 }
  0x17   :  { %3655 = dma.done.wait [#allocation9], 2048  }
  0x18   :  { %3656 = vsyncadd [#allocation9], 4294965248  ;;  %v3282_v0 = vld [vmem:[#allocation5 + $0x38] sm:$0xff]  ;;  %v3281_v4 = vld [vmem:[#allocation5 + $0x30] sm:$0xff]  ;;  %vm2366_vm0 = vcmask 1040384   ;;  %vm2370_vm1 = vcmask 1041409  }
  0x19   :  { %v3290_v1 = vld [vmem:[#allocation5 + $0x78] sm:$0xff]  ;;  %1802 = vmatpush.bf16.msra.mxu0 %v3282_v0  ;;  %v3289_v5 = vld [vmem:[#allocation5 + $0x70] sm:$0xff]  ;;  %v3280_v8 = vld [vmem:[#allocation5 + $0x28] sm:$0xff]  ;;  %vm2374_vm2 = vcmask 1042434   ;;  %vm2378_vm3 = vcmask 1043459  }
  0x1a   :  { %v3298_v2 = vld [vmem:[#allocation5 + $0xb8] sm:$0xff]  ;;  %1815 = vmatpush.bf16.msra.mxu1 %v3290_v1  ;;  %v3297_v6 = vld [vmem:[#allocation5 + $0xb0] sm:$0xff]  ;;  %v3288_v9 = vld [vmem:[#allocation5 + $0x68] sm:$0xff] }
  0x1b   :  { %v3306_v3 = vld [vmem:[#allocation5 + $0xf8] sm:$0xff]  ;;  %1828 = vmatpush.bf16.msra.mxu2 %v3298_v2  ;;  %v3305_v7 = vld [vmem:[#allocation5 + $0xf0] sm:$0xff]  ;;  %v3296_v10 = vld [vmem:[#allocation5 + $0xa8] sm:$0xff] }
  0x1c   :  { %1841 = vmatpush.bf16.msra.mxu3 %v3306_v3  ;;  %v3304_v11 = vld [vmem:[#allocation5 + $0xe8] sm:$0xff]  ;;  %v3279_v12 = vld [vmem:[#allocation5 + $0x20] sm:$0xff]  ;;  %v3278_v16 = vld [vmem:[#allocation5 + $0x18] sm:$0xff] }
  0x1d   :  { %1803 = vmatpush.bf16.msra.mxu0 %v3281_v4  ;;  %v3287_v13 = vld [vmem:[#allocation5 + $0x60] sm:$0xff]  ;;  %v3286_v17 = vld [vmem:[#allocation5 + $0x58] sm:$0xff]  ;;  %v3277_v20 = vld [vmem:[#allocation5 + $0x10] sm:$0xff] }
  0x1e   :  { %1816 = vmatpush.bf16.msra.mxu1 %v3289_v5  ;;  %v3295_v14 = vld [vmem:[#allocation5 + $0xa0] sm:$0xff]  ;;  %v3294_v18 = vld [vmem:[#allocation5 + $0x98] sm:$0xff]  ;;  %v3285_v21 = vld [vmem:[#allocation5 + $0x50] sm:$0xff] }
  0x1f   :  { %1829 = vmatpush.bf16.msra.mxu2 %v3297_v6  ;;  %v3303_v15 = vld [vmem:[#allocation5 + $0xe0] sm:$0xff]  ;;  %v3302_v19 = vld [vmem:[#allocation5 + $0xd8] sm:$0xff]  ;;  %v117_v23 = vld [vmem:[#allocation2 + $0x30] sm:$0xff] }
  0x20   :  { %1842 = vmatpush.bf16.msra.mxu3 %v3305_v7  ;;  %v111_v22 = vld [vmem:[#allocation2] sm:$0xff]  ;;  %v129_v25 = vld [vmem:[#allocation2 + $0x90] sm:$0xff]  ;;  %161 = vst [vmem:[#allocation1 + $0x1] ss:$4 sm:$0xff] %v117_v23  ;;  %v3276_v28 = vld [vmem:[#allocation5 + $0x8] sm:$0xff] }
  0x21   :  { %1804 = vmatpush.bf16.msra.mxu0 %v3280_v8  ;;  %v123_v24 = vld [vmem:[#allocation2 + $0x60] sm:$0xff]  ;;  %159 = vst [vmem:[#allocation1] ss:$4 sm:$0xff] %v111_v22  ;;  %v3293_v26 = vld [vmem:[#allocation5 + $0x90] sm:$0xff]  ;;  %v3284_v29 = vld [vmem:[#allocation5 + $0x48] sm:$0xff] }
  0x22   :  { %1817 = vmatpush.bf16.msra.mxu1 %v3288_v9  ;;  %v3301_v27 = vld [vmem:[#allocation5 + $0xd0] sm:$0xff]  ;;  %163 = vst [vmem:[#allocation1 + $0x2] ss:$4 sm:$0xff] %v123_v24  ;;  %v3292_v30 = vld [vmem:[#allocation5 + $0x88] sm:$0xff]  ;;  %v3275_v32 = vld [vmem:[#allocation5] sm:$0xff] }
  0x23   :  { %1830 = vmatpush.bf16.msra.mxu2 %v3296_v10  ;;  %165 = vst [vmem:[#allocation1 + $0x3] ss:$4 sm:$0xff] %v129_v25  ;;  %v3300_v31 = vld [vmem:[#allocation5 + $0xc8] sm:$0xff]  ;;  %v3283_v33 = vld [vmem:[#allocation5 + $0x40] sm:$0xff]  ;;  %v3314_v36 = vld [vmem:[#allocation5 + $0x138] sm:$0xff] }
  0x24   :  { %1843 = vmatpush.bf16.msra.mxu3 %v3304_v11  ;;  %v3291_v34 = vld [vmem:[#allocation5 + $0x80] sm:$0xff]  ;;  %v3322_v37 = vld [vmem:[#allocation5 + $0x178] sm:$0xff]  ;;  %v113_v40 = vld [vmem:[#allocation2 + $0x10] sm:$0xff] }
  0x25   :  { %1805 = vmatpush.bf16.msra.mxu0 %v3279_v12  ;;  %v3299_v35 = vld [vmem:[#allocation5 + $0xc0] sm:$0xff]  ;;  %v3330_v38 = vld [vmem:[#allocation5 + $0x1b8] sm:$0xff]  ;;  %v125_v42 = vld [vmem:[#allocation2 + $0x70] sm:$0xff] }
  0x26   :  { %1818 = vmatpush.bf16.msra.mxu1 %v3287_v13  ;;  %v3338_v39 = vld [vmem:[#allocation5 + $0x1f8] sm:$0xff]  ;;  %v119_v41 = vld [vmem:[#allocation2 + $0x40] sm:$0xff]  ;;  %v112_v52 = vld [vmem:[#allocation2 + $0x8] sm:$0xff] }
  0x27   :  { %1831 = vmatpush.bf16.msra.mxu2 %v3295_v14  ;;  %v131_v49 = vld [vmem:[#allocation2 + $0xa0] sm:$0xff]  ;;  %v3313_v53 = vld [vmem:[#allocation5 + $0x130] sm:$0xff]  ;;  %v118_v55 = vld [vmem:[#allocation2 + $0x38] sm:$0xff]  ;;  %167 = vst [vmem:[#allocation1 + $0x20] ss:$4 sm:$0xff] %v112_v52 }
  0x28   :  { %1844 = vmatpush.bf16.msra.mxu3 %v3303_v15  ;;  %v3321_v54 = vld [vmem:[#allocation5 + $0x170] sm:$0xff]  ;;  %v124_v58 = vld [vmem:[#allocation2 + $0x68] sm:$0xff]  ;;  %v130_v59 = vld [vmem:[#allocation2 + $0x98] sm:$0xff]  ;;  %169 = vst [vmem:[#allocation1 + $0x21] ss:$4 sm:$0xff] %v118_v55 }
  0x29   :  { %1806 = vmatpush.bf16.msra.mxu0 %v3278_v16  ;;  %v3329_v56 = vld [vmem:[#allocation5 + $0x1b0] sm:$0xff]  ;;  %v3312_v60 = vld [vmem:[#allocation5 + $0x128] sm:$0xff]  ;;  %171 = vst [vmem:[#allocation1 + $0x22] ss:$4 sm:$0xff] %v124_v58  ;;  %v3311_v0 = vld [vmem:[#allocation5 + $0x120] sm:$0xff] }
  0x2a   :  { %1819 = vmatpush.bf16.msra.mxu1 %v3286_v17  ;;  %v176_v43 = vld.sshfl [vmem:[#allocation1 + $0x10] sm:$0xff pattern:$0x73625140]  ;;  %v174_v44 = vld.sshfl [vmem:[#allocation1] sm:$0xff pattern:$0x73625140] }
  0x2b   :  { %1832 = vmatpush.bf16.msra.mxu2 %v3294_v18  ;;  %v177_v45 = vld.sshfl [vmem:[#allocation1 + $0x18] sm:$0xff pattern:$0x73625140]  ;;  %v175_v46 = vld.sshfl [vmem:[#allocation1 + $0x8] sm:$0xff pattern:$0x73625140]  ;;  %v240_v47 = vpack.c.bf16 %v176_v43, %v176_v43  ;;  %v238_v48 = vpack.c.bf16 %v174_v44, %v174_v44 }
  0x2c   :  { %1845 = vmatpush.bf16.msra.mxu3 %v3302_v19  ;;  %182 = vst [vmem:[#allocation1] ss:$4 sm:$0xff] %v113_v40  ;;  %v241_v50 = vpack.c.bf16 %v177_v45, %v177_v45  ;;  %v239_v51 = vpack.c.bf16 %v175_v46, %v175_v46  ;;  %v3337_v57 = vld [vmem:[#allocation5 + $0x1f0] sm:$0xff]  ;;  %v3320_v61 = vld [vmem:[#allocation5 + $0x168] sm:$0xff]  ;;  %v3319_v1 = vld [vmem:[#allocation5 + $0x160] sm:$0xff] }
  0x2d   :  { %1807 = vmatpush.bf16.msra.mxu0 %v3277_v20  ;;  %183 = vst [vmem:[#allocation1 + $0x1] ss:$4 sm:$0xff] %v119_v41  ;;  %v3328_v62 = vld [vmem:[#allocation5 + $0x1a8] sm:$0xff]  ;;  %v3327_v2 = vld [vmem:[#allocation5 + $0x1a0] sm:$0xff]  ;;  %v3310_v4 = vld [vmem:[#allocation5 + $0x118] sm:$0xff] }
  0x2e   :  { %1820 = vmatpush.bf16.msra.mxu1 %v3285_v21  ;;  %184 = vst [vmem:[#allocation1 + $0x2] ss:$4 sm:$0xff] %v125_v42  ;;  %v3336_v63 = vld [vmem:[#allocation5 + $0x1e8] sm:$0xff]  ;;  %v3335_v3 = vld [vmem:[#allocation5 + $0x1e0] sm:$0xff]  ;;  %v3318_v5 = vld [vmem:[#allocation5 + $0x158] sm:$0xff] }
  0x2f   :  { %1833 = vmatpush.bf16.msra.mxu2 %v3293_v26  ;;  %185 = vst [vmem:[#allocation1 + $0x3] ss:$4 sm:$0xff] %v131_v49  ;;  %v3326_v6 = vld [vmem:[#allocation5 + $0x198] sm:$0xff]  ;;  %v120_v9 = vld [vmem:[#allocation2 + $0x48] sm:$0xff]  ;;  %v3309_v16 = vld [vmem:[#allocation5 + $0x110] sm:$0xff] }
  0x30   :  { %1846 = vmatpush.bf16.msra.mxu3 %v3301_v27  ;;  %173 = vst [vmem:[#allocation1 + $0x23] ss:$4 sm:$0xff] %v130_v59  ;;  %v3334_v7 = vld [vmem:[#allocation5 + $0x1d8] sm:$0xff]  ;;  %v132_v15 = vld [vmem:[#allocation2 + $0xa8] sm:$0xff]  ;;  %v3317_v17 = vld [vmem:[#allocation5 + $0x150] sm:$0xff] }
  0x31   :  { %1808 = vmatpush.bf16.msra.mxu0 %v3276_v28  ;;  %v114_v8 = vld [vmem:[#allocation2 + $0x18] sm:$0xff]  ;;  %v3325_v18 = vld [vmem:[#allocation5 + $0x190] sm:$0xff]  ;;  %v3308_v20 = vld [vmem:[#allocation5 + $0x108] sm:$0xff] }
  0x32   :  { %1821 = vmatpush.bf16.msra.mxu1 %v3284_v29  ;;  %v126_v10 = vld [vmem:[#allocation2 + $0x78] sm:$0xff]  ;;  %v3333_v19 = vld [vmem:[#allocation5 + $0x1d0] sm:$0xff]  ;;  %v3316_v21 = vld [vmem:[#allocation5 + $0x148] sm:$0xff] }
  0x33   :  { %1834 = vmatpush.bf16.msra.mxu2 %v3292_v30  ;;  %v3324_v22 = vld [vmem:[#allocation5 + $0x188] sm:$0xff]  ;;  %v3307_v24 = vld [vmem:[#allocation5 + $0x100] sm:$0xff]  ;;  %v3346_v28 = vld [vmem:[#allocation5 + $0x238] sm:$0xff] }
  0x34   :  { %1847 = vmatpush.bf16.msra.mxu3 %v3300_v31  ;;  %v3332_v23 = vld [vmem:[#allocation5 + $0x1c8] sm:$0xff]  ;;  %v3315_v25 = vld [vmem:[#allocation5 + $0x140] sm:$0xff]  ;;  %v3354_v29 = vld [vmem:[#allocation5 + $0x278] sm:$0xff] }
  0x35   :  { %1809 = vmatpush.bf16.msra.mxu0 %v3275_v32  ;;  %v3323_v26 = vld [vmem:[#allocation5 + $0x180] sm:$0xff]  ;;  %v3362_v30 = vld [vmem:[#allocation5 + $0x2b8] sm:$0xff]  ;;  %v3344_v40 = vld [vmem:[#allocation5 + $0x228] sm:$0xff] }
  0x36   :  { %1822 = vmatpush.bf16.msra.mxu1 %v3283_v33  ;;  %v3331_v27 = vld [vmem:[#allocation5 + $0x1c0] sm:$0xff]  ;;  %v3370_v31 = vld [vmem:[#allocation5 + $0x2f8] sm:$0xff]  ;;  %v3352_v41 = vld [vmem:[#allocation5 + $0x268] sm:$0xff] }
  0x37   :  { %1835 = vmatpush.bf16.msra.mxu2 %v3291_v34  ;;  %v180_v11 = vld.sshfl [vmem:[#allocation1 + $0x30] sm:$0xff pattern:$0x73625140]  ;;  %v178_v12 = vld.sshfl [vmem:[#allocation1 + $0x20] sm:$0xff pattern:$0x73625140] }
  0x38   :  { %1848 = vmatpush.bf16.msra.mxu3 %v3299_v35  ;;  %1810 = vmatmul.bf16.vlgmr.msra.gmra.mxu0 %v238_v48  ;;  %v181_v13 = vld.sshfl [vmem:[#allocation1 + $0x38] sm:$0xff pattern:$0x73625140]  ;;  %v179_v14 = vld.sshfl [vmem:[#allocation1 + $0x28] sm:$0xff pattern:$0x73625140]  ;;  %v244_v32 = vpack.c.bf16 %v180_v11, %v180_v11  ;;  %v242_v33 = vpack.c.bf16 %v178_v12, %v178_v12 }
  0x39   :  { %1854 = vmatpush.bf16.msrb.mxu0 %v3314_v36  ;;  %1823 = vmatmul.bf16.vlgmr.msra.gmra.mxu1 %v239_v51  ;;  %186 = vst [vmem:[#allocation1 + $0x20] ss:$4 sm:$0xff] %v114_v8  ;;  %v245_v34 = vpack.c.bf16 %v181_v13, %v181_v13  ;;  %v243_v35 = vpack.c.bf16 %v179_v14, %v179_v14  ;;  %v3345_v36 = vld [vmem:[#allocation5 + $0x230] sm:$0xff]  ;;  %v3360_v42 = vld [vmem:[#allocation5 + $0x2a8] sm:$0xff]  ;;  %v3343_v44 = vld [vmem:[#allocation5 + $0x220] sm:$0xff] }
  0x3a   :  { %1867 = vmatpush.bf16.msrb.mxu1 %v3322_v37  ;;  %1836 = vmatmul.bf16.vlgmr.msra.gmra.mxu2 %v240_v47  ;;  %187 = vst [vmem:[#allocation1 + $0x21] ss:$4 sm:$0xff] %v120_v9  ;;  %v3353_v37 = vld [vmem:[#allocation5 + $0x270] sm:$0xff]  ;;  %v3368_v43 = vld [vmem:[#allocation5 + $0x2e8] sm:$0xff]  ;;  %v3351_v45 = vld [vmem:[#allocation5 + $0x260] sm:$0xff] }
  0x3b   :  { %1880 = vmatpush.bf16.msrb.mxu2 %v3330_v38  ;;  %1849 = vmatmul.bf16.vlgmr.msra.gmra.mxu3 %v241_v50  ;;  %188 = vst [vmem:[#allocation1 + $0x22] ss:$4 sm:$0xff] %v126_v10  ;;  %v3361_v38 = vld [vmem:[#allocation5 + $0x2b0] sm:$0xff]  ;;  %v3359_v46 = vld [vmem:[#allocation5 + $0x2a0] sm:$0xff]  ;;  %v3342_v48 = vld [vmem:[#allocation5 + $0x218] sm:$0xff] }
  0x3c   :  { %1893 = vmatpush.bf16.msrb.mxu3 %v3338_v39  ;;  %189 = vst [vmem:[#allocation1 + $0x23] ss:$4 sm:$0xff] %v132_v15  ;;  %v3369_v39 = vld [vmem:[#allocation5 + $0x2f0] sm:$0xff]  ;;  %v3367_v47 = vld [vmem:[#allocation5 + $0x2e0] sm:$0xff]  ;;  %v3350_v49 = vld [vmem:[#allocation5 + $0x258] sm:$0xff] }
  0x3d   :  { %1855 = vmatpush.bf16.msrb.mxu0 %v3313_v53  ;;  %v3358_v50 = vld [vmem:[#allocation5 + $0x298] sm:$0xff]  ;;  %v3341_v52 = vld [vmem:[#allocation5 + $0x210] sm:$0xff]  ;;  %v3356_v58 = vld [vmem:[#allocation5 + $0x288] sm:$0xff] }
  0x3e   :  { %1868 = vmatpush.bf16.msrb.mxu1 %v3321_v54  ;;  %v3366_v51 = vld [vmem:[#allocation5 + $0x2d8] sm:$0xff]  ;;  %v3349_v53 = vld [vmem:[#allocation5 + $0x250] sm:$0xff]  ;;  %v3364_v59 = vld [vmem:[#allocation5 + $0x2c8] sm:$0xff] }
  0x3f   :  { %1881 = vmatpush.bf16.msrb.mxu2 %v3329_v56  ;;  %v3357_v54 = vld [vmem:[#allocation5 + $0x290] sm:$0xff]  ;;  %v3340_v56 = vld [vmem:[#allocation5 + $0x208] sm:$0xff] }
  0x40   :  { %1894 = vmatpush.bf16.msrb.mxu3 %v3337_v57  ;;  %v3365_v55 = vld [vmem:[#allocation5 + $0x2d0] sm:$0xff]  ;;  %v3348_v57 = vld [vmem:[#allocation5 + $0x248] sm:$0xff] }
  0x41   :  { %1856 = vmatpush.bf16.msrb.mxu0 %v3312_v60  ;;  %v3339_v60 = vld [vmem:[#allocation5 + $0x200] sm:$0xff]  ;;  %v3377_v12 = vld [vmem:[#allocation5 + $0x330] sm:$0xff] }
  0x42   :  { %1869 = vmatpush.bf16.msrb.mxu1 %v3320_v61  ;;  %v3347_v61 = vld [vmem:[#allocation5 + $0x240] sm:$0xff]  ;;  %v3385_v13 = vld [vmem:[#allocation5 + $0x370] sm:$0xff] }
  0x43   :  { %1882 = vmatpush.bf16.msrb.mxu2 %v3328_v62  ;;  %v3355_v62 = vld [vmem:[#allocation5 + $0x280] sm:$0xff]  ;;  %v3393_v14 = vld [vmem:[#allocation5 + $0x3b0] sm:$0xff] }
  0x44   :  { %1895 = vmatpush.bf16.msrb.mxu3 %v3336_v63  ;;  %v3363_v63 = vld [vmem:[#allocation5 + $0x2c0] sm:$0xff]  ;;  %v3401_v15 = vld [vmem:[#allocation5 + $0x3f0] sm:$0xff] }
  0x45   :  { %1857 = vmatpush.bf16.msrb.mxu0 %v3311_v0  ;;  %v3378_v0 = vld [vmem:[#allocation5 + $0x338] sm:$0xff] }
  0x46   :  { %1870 = vmatpush.bf16.msrb.mxu1 %v3319_v1  ;;  %v3386_v1 = vld [vmem:[#allocation5 + $0x378] sm:$0xff] }
  0x47   :  { %1883 = vmatpush.bf16.msrb.mxu2 %v3327_v2  ;;  %v190_v2 = vld.sshfl [vmem:[#allocation1] sm:$0xff pattern:$0x73625140] }
  0x48   :  { %1896 = vmatpush.bf16.msrb.mxu3 %v3335_v3  ;;  %v192_v3 = vld.sshfl [vmem:[#allocation1 + $0x10] sm:$0xff pattern:$0x73625140]  ;;  %v246_v8 = vpack.c.bf16 %v190_v2, %v190_v2  ;;  %v3423_v2 = vld [vmem:[#allocation5 + $0x4a0] sm:$0xff] }
  0x49   :  { %1858 = vmatpush.bf16.msrb.mxu0 %v3310_v4  ;;  %v191_v4 = vld.sshfl [vmem:[#allocation1 + $0x8] sm:$0xff pattern:$0x73625140]  ;;  %v248_v9 = vpack.c.bf16 %v192_v3, %v192_v3 }
  0x4a   :  { %1871 = vmatpush.bf16.msrb.mxu1 %v3318_v5  ;;  %v193_v5 = vld.sshfl [vmem:[#allocation1 + $0x18] sm:$0xff pattern:$0x73625140]  ;;  %v247_v10 = vpack.c.bf16 %v191_v4, %v191_v4  ;;  %v3431_v3 = vld [vmem:[#allocation5 + $0x4e0] sm:$0xff]  ;;  %v3406_v4 = vld [vmem:[#allocation5 + $0x418] sm:$0xff] }
  0x4b   :  { %1884 = vmatpush.bf16.msrb.mxu2 %v3326_v6  ;;  %v3394_v6 = vld [vmem:[#allocation5 + $0x3b8] sm:$0xff]  ;;  %v249_v11 = vpack.c.bf16 %v193_v5, %v193_v5 }
  0x4c   :  { %1897 = vmatpush.bf16.msrb.mxu3 %v3334_v7  ;;  %v3402_v7 = vld [vmem:[#allocation5 + $0x3f8] sm:$0xff] }
  0x4d   :  { %1859 = vmatpush.bf16.msrb.mxu0 %v3309_v16  ;;  %v3376_v16 = vld [vmem:[#allocation5 + $0x328] sm:$0xff]  ;;  %v3414_v5 = vld [vmem:[#allocation5 + $0x458] sm:$0xff] }
  0x4e   :  { %1872 = vmatpush.bf16.msrb.mxu1 %v3317_v17  ;;  %v3384_v17 = vld [vmem:[#allocation5 + $0x368] sm:$0xff] }
  0x4f   :  { %1885 = vmatpush.bf16.msrb.mxu2 %v3325_v18  ;;  %v3392_v18 = vld [vmem:[#allocation5 + $0x3a8] sm:$0xff] }
  0x50   :  { %1898 = vmatpush.bf16.msrb.mxu3 %v3333_v19  ;;  %v3400_v19 = vld [vmem:[#allocation5 + $0x3e8] sm:$0xff] }
  0x51   :  { %1860 = vmatpush.bf16.msrb.mxu0 %v3308_v20  ;;  %v3375_v20 = vld [vmem:[#allocation5 + $0x320] sm:$0xff] }
  0x52   :  { %1873 = vmatpush.bf16.msrb.mxu1 %v3316_v21  ;;  %v3383_v21 = vld [vmem:[#allocation5 + $0x360] sm:$0xff] }
  0x53   :  { %1886 = vmatpush.bf16.msrb.mxu2 %v3324_v22  ;;  %v3391_v22 = vld [vmem:[#allocation5 + $0x3a0] sm:$0xff] }
  0x54   :  { %1899 = vmatpush.bf16.msrb.mxu3 %v3332_v23  ;;  %v3399_v23 = vld [vmem:[#allocation5 + $0x3e0] sm:$0xff] }
  0x55   :  { %1861 = vmatpush.bf16.msrb.mxu0 %v3307_v24  ;;  %v3374_v24 = vld [vmem:[#allocation5 + $0x318] sm:$0xff] }
  0x56   :  { %1874 = vmatpush.bf16.msrb.mxu1 %v3315_v25  ;;  %v3382_v25 = vld [vmem:[#allocation5 + $0x358] sm:$0xff] }
  0x57   :  { %1887 = vmatpush.bf16.msrb.mxu2 %v3323_v26  ;;  %v3390_v26 = vld [vmem:[#allocation5 + $0x398] sm:$0xff] }
  0x58   :  { %1900 = vmatpush.bf16.msrb.mxu3 %v3331_v27  ;;  %1862 = vmatmul.bf16.vlgmr.msrb.gmra.mxu0 %v242_v33  ;;  %v3398_v27 = vld [vmem:[#allocation5 + $0x3d8] sm:$0xff]  ;;  %v3380_v33 = vld [vmem:[#allocation5 + $0x348] sm:$0xff] }
  0x59   :  { %1906 = vmatpush.bf16.msra.mxu0 %v3346_v28  ;;  %1875 = vmatmul.bf16.vlgmr.msrb.gmra.mxu1 %v243_v35  ;;  %v3373_v28 = vld [vmem:[#allocation5 + $0x310] sm:$0xff] }
  0x5a   :  { %1919 = vmatpush.bf16.msra.mxu1 %v3354_v29  ;;  %1888 = vmatmul.bf16.vlgmr.msrb.gmra.mxu2 %v244_v32  ;;  %v3381_v29 = vld [vmem:[#allocation5 + $0x350] sm:$0xff]  ;;  %v3372_v32 = vld [vmem:[#allocation5 + $0x308] sm:$0xff] }
  0x5b   :  { %1932 = vmatpush.bf16.msra.mxu2 %v3362_v30  ;;  %1901 = vmatmul.bf16.vlgmr.msrb.gmra.mxu3 %v245_v34  ;;  %v3389_v30 = vld [vmem:[#allocation5 + $0x390] sm:$0xff]  ;;  %v115_v34 = vld [vmem:[#allocation2 + $0x20] sm:$0xff] }
  0x5c   :  { %1945 = vmatpush.bf16.msra.mxu3 %v3370_v31  ;;  %v3397_v31 = vld [vmem:[#allocation5 + $0x3d0] sm:$0xff]  ;;  %198 = vst [vmem:[#allocation1] ss:$4 sm:$0xff] %v115_v34 }
  0x5d   :  { %1907 = vmatpush.bf16.msra.mxu0 %v3345_v36  ;;  %v121_v35 = vld [vmem:[#allocation2 + $0x50] sm:$0xff]  ;;  %v127_v36 = vld [vmem:[#allocation2 + $0x80] sm:$0xff] }
  0x5e   :  { %1920 = vmatpush.bf16.msra.mxu1 %v3353_v37  ;;  %v3388_v37 = vld [vmem:[#allocation5 + $0x388] sm:$0xff]  ;;  %199 = vst [vmem:[#allocation1 + $0x1] ss:$4 sm:$0xff] %v121_v35 }
  0x5f   :  { %1933 = vmatpush.bf16.msra.mxu2 %v3361_v38  ;;  %v3396_v38 = vld [vmem:[#allocation5 + $0x3c8] sm:$0xff]  ;;  %200 = vst [vmem:[#allocation1 + $0x2] ss:$4 sm:$0xff] %v127_v36  ;;  %v3441_v36 = vld [vmem:[#allocation5 + $0x530] sm:$0xff] }
  0x60   :  { %1946 = vmatpush.bf16.msra.mxu3 %v3369_v39  ;;  %v133_v39 = vld [vmem:[#allocation2 + $0xb0] sm:$0xff] }
  0x61   :  { %1908 = vmatpush.bf16.msra.mxu0 %v3344_v40  ;;  %v3371_v40 = vld [vmem:[#allocation5 + $0x300] sm:$0xff]  ;;  %201 = vst [vmem:[#allocation1 + $0x3] ss:$4 sm:$0xff] %v133_v39  ;;  %v3465_v39 = vld [vmem:[#allocation5 + $0x5f0] sm:$0xff] }
  0x62   :  { %1921 = vmatpush.bf16.msra.mxu1 %v3352_v41  ;;  %v3379_v41 = vld [vmem:[#allocation5 + $0x340] sm:$0xff] }
  0x63   :  { %1934 = vmatpush.bf16.msra.mxu2 %v3360_v42  ;;  %v3387_v42 = vld [vmem:[#allocation5 + $0x380] sm:$0xff] }
  0x64   :  { %1947 = vmatpush.bf16.msra.mxu3 %v3368_v43  ;;  %v3395_v43 = vld [vmem:[#allocation5 + $0x3c0] sm:$0xff] }
  0x65   :  { %1909 = vmatpush.bf16.msra.mxu0 %v3343_v44  ;;  %v3410_v44 = vld [vmem:[#allocation5 + $0x438] sm:$0xff] }
  0x66   :  { %1922 = vmatpush.bf16.msra.mxu1 %v3351_v45  ;;  %v3418_v45 = vld [vmem:[#allocation5 + $0x478] sm:$0xff] }
  0x67   :  { %1935 = vmatpush.bf16.msra.mxu2 %v3359_v46  ;;  %v194_v46 = vld.sshfl [vmem:[#allocation1 + $0x20] sm:$0xff pattern:$0x73625140] }
  0x68   :  { %1948 = vmatpush.bf16.msra.mxu3 %v3367_v47  ;;  %v196_v47 = vld.sshfl [vmem:[#allocation1 + $0x30] sm:$0xff pattern:$0x73625140] }
  0x69   :  { %1910 = vmatpush.bf16.msra.mxu0 %v3342_v48  ;;  %v195_v48 = vld.sshfl [vmem:[#allocation1 + $0x28] sm:$0xff pattern:$0x73625140] }
  0x6a   :  { %1923 = vmatpush.bf16.msra.mxu1 %v3350_v49  ;;  %v197_v49 = vld.sshfl [vmem:[#allocation1 + $0x38] sm:$0xff pattern:$0x73625140] }
  0x6b   :  { %1936 = vmatpush.bf16.msra.mxu2 %v3358_v50  ;;  %v3426_v50 = vld [vmem:[#allocation5 + $0x4b8] sm:$0xff] }
  0x6c   :  { %1949 = vmatpush.bf16.msra.mxu3 %v3366_v51  ;;  %v3434_v51 = vld [vmem:[#allocation5 + $0x4f8] sm:$0xff] }
  0x6d   :  { %1911 = vmatpush.bf16.msra.mxu0 %v3341_v52  ;;  %v250_v52 = vpack.c.bf16 %v194_v46, %v194_v46  ;;  %v3439_v46 = vld [vmem:[#allocation5 + $0x520] sm:$0xff] }
  0x6e   :  { %1924 = vmatpush.bf16.msra.mxu1 %v3349_v53  ;;  %v252_v53 = vpack.c.bf16 %v196_v47, %v196_v47  ;;  %v3447_v47 = vld [vmem:[#allocation5 + $0x560] sm:$0xff] }
  0x6f   :  { %1937 = vmatpush.bf16.msra.mxu2 %v3357_v54  ;;  %v251_v54 = vpack.c.bf16 %v195_v48, %v195_v48 }
  0x70   :  { %1950 = vmatpush.bf16.msra.mxu3 %v3365_v55  ;;  %v253_v55 = vpack.c.bf16 %v197_v49, %v197_v49 }
  0x71   :  { %1912 = vmatpush.bf16.msra.mxu0 %v3340_v56  ;;  %v3409_v56 = vld [vmem:[#allocation5 + $0x430] sm:$0xff] }
  0x72   :  { %1925 = vmatpush.bf16.msra.mxu1 %v3348_v57  ;;  %v3417_v57 = vld [vmem:[#allocation5 + $0x470] sm:$0xff] }
  0x73   :  { %1938 = vmatpush.bf16.msra.mxu2 %v3356_v58  ;;  %v3425_v58 = vld [vmem:[#allocation5 + $0x4b0] sm:$0xff] }
  0x74   :  { %1951 = vmatpush.bf16.msra.mxu3 %v3364_v59  ;;  %v3433_v59 = vld [vmem:[#allocation5 + $0x4f0] sm:$0xff] }
  0x75   :  { %1913 = vmatpush.bf16.msra.mxu0 %v3339_v60  ;;  %v3408_v60 = vld [vmem:[#allocation5 + $0x428] sm:$0xff] }
  0x76   :  { %1926 = vmatpush.bf16.msra.mxu1 %v3347_v61  ;;  %v3416_v61 = vld [vmem:[#allocation5 + $0x468] sm:$0xff] }
  0x77   :  { %1939 = vmatpush.bf16.msra.mxu2 %v3355_v62  ;;  %v3424_v62 = vld [vmem:[#allocation5 + $0x4a8] sm:$0xff] }
  0x78   :  { %1952 = vmatpush.bf16.msra.mxu3 %v3363_v63  ;;  %1914 = vmatmul.bf16.vlgmr.msra.gmra.mxu0 %v246_v8  ;;  %v3432_v63 = vld [vmem:[#allocation5 + $0x4e8] sm:$0xff]  ;;  %v3405_v8 = vld [vmem:[#allocation5 + $0x410] sm:$0xff] }
  0x79   :  { %1958 = vmatpush.bf16.msrb.mxu0 %v3378_v0  ;;  %1927 = vmatmul.bf16.vlgmr.msra.gmra.mxu1 %v247_v10  ;;  %v3407_v0 = vld [vmem:[#allocation5 + $0x420] sm:$0xff]  ;;  %v3421_v10 = vld [vmem:[#allocation5 + $0x490] sm:$0xff] }
  0x7a   :  { %1971 = vmatpush.bf16.msrb.mxu1 %v3386_v1  ;;  %1940 = vmatmul.bf16.vlgmr.msra.gmra.mxu2 %v248_v9  ;;  %v3415_v1 = vld [vmem:[#allocation5 + $0x460] sm:$0xff]  ;;  %v3413_v9 = vld [vmem:[#allocation5 + $0x450] sm:$0xff] }
  0x7b   :  { %1984 = vmatpush.bf16.msrb.mxu2 %v3394_v6  ;;  %1953 = vmatmul.bf16.vlgmr.msra.gmra.mxu3 %v249_v11  ;;  %v3422_v6 = vld [vmem:[#allocation5 + $0x498] sm:$0xff]  ;;  %v3429_v11 = vld [vmem:[#allocation5 + $0x4d0] sm:$0xff] }
  0x7c   :  { %1997 = vmatpush.bf16.msrb.mxu3 %v3402_v7  ;;  %v3430_v7 = vld [vmem:[#allocation5 + $0x4d8] sm:$0xff] }
  0x7d   :  { %1959 = vmatpush.bf16.msrb.mxu0 %v3377_v12  ;;  %v3404_v12 = vld [vmem:[#allocation5 + $0x408] sm:$0xff] }
  0x7e   :  { %1972 = vmatpush.bf16.msrb.mxu1 %v3385_v13  ;;  %v116_v13 = vld [vmem:[#allocation2 + $0x28] sm:$0xff] }
  0x7f   :  { %1985 = vmatpush.bf16.msrb.mxu2 %v3393_v14  ;;  %v122_v14 = vld [vmem:[#allocation2 + $0x58] sm:$0xff]  ;;  %202 = vst [vmem:[#allocation1 + $0x20] ss:$4 sm:$0xff] %v116_v13 }
  0x80   :  { %1998 = vmatpush.bf16.msrb.mxu3 %v3401_v15  ;;  %v3412_v15 = vld [vmem:[#allocation5 + $0x448] sm:$0xff]  ;;  %203 = vst [vmem:[#allocation1 + $0x21] ss:$4 sm:$0xff] %v122_v14 }
  0x81   :  { %1960 = vmatpush.bf16.msrb.mxu0 %v3376_v16  ;;  %v128_v16 = vld [vmem:[#allocation2 + $0x88] sm:$0xff] }
  0x82   :  { %1973 = vmatpush.bf16.msrb.mxu1 %v3384_v17  ;;  %v134_v17 = vld [vmem:[#allocation2 + $0xb8] sm:$0xff]  ;;  %204 = vst [vmem:[#allocation1 + $0x22] ss:$4 sm:$0xff] %v128_v16 }
  0x83   :  { %1986 = vmatpush.bf16.msrb.mxu2 %v3392_v18  ;;  %v3420_v18 = vld [vmem:[#allocation5 + $0x488] sm:$0xff]  ;;  %205 = vst [vmem:[#allocation1 + $0x23] ss:$4 sm:$0xff] %v134_v17 }
  0x84   :  { %1999 = vmatpush.bf16.msrb.mxu3 %v3400_v19  ;;  %v3428_v19 = vld [vmem:[#allocation5 + $0x4c8] sm:$0xff] }
  0x85   :  { %1961 = vmatpush.bf16.msrb.mxu0 %v3375_v20  ;;  %v3403_v20 = vld [vmem:[#allocation5 + $0x400] sm:$0xff] }
  0x86   :  { %1974 = vmatpush.bf16.msrb.mxu1 %v3383_v21  ;;  %v3411_v21 = vld [vmem:[#allocation5 + $0x440] sm:$0xff] }
  0x87   :  { %1987 = vmatpush.bf16.msrb.mxu2 %v3391_v22  ;;  %v3419_v22 = vld [vmem:[#allocation5 + $0x480] sm:$0xff] }
  0x88   :  { %2000 = vmatpush.bf16.msrb.mxu3 %v3399_v23  ;;  %v3427_v23 = vld [vmem:[#allocation5 + $0x4c0] sm:$0xff] }
  0x89   :  { %1962 = vmatpush.bf16.msrb.mxu0 %v3374_v24  ;;  %v3442_v24 = vld [vmem:[#allocation5 + $0x538] sm:$0xff] }
  0x8a   :  { %1975 = vmatpush.bf16.msrb.mxu1 %v3382_v25  ;;  %v3450_v25 = vld [vmem:[#allocation5 + $0x578] sm:$0xff]  ;;  %v211_v14 = vld.sshfl [vmem:[#allocation1 + $0x28] sm:$0xff pattern:$0x73625140] }
  0x8b   :  { %1988 = vmatpush.bf16.msrb.mxu2 %v3390_v26  ;;  %v206_v26 = vld.sshfl [vmem:[#allocation1] sm:$0xff pattern:$0x73625140]  ;;  %v213_v16 = vld.sshfl [vmem:[#allocation1 + $0x38] sm:$0xff pattern:$0x73625140] }
  0x8c   :  { %2001 = vmatpush.bf16.msrb.mxu3 %v3398_v27  ;;  %v208_v27 = vld.sshfl [vmem:[#allocation1 + $0x10] sm:$0xff pattern:$0x73625140]  ;;  %v210_v13 = vld.sshfl [vmem:[#allocation1 + $0x20] sm:$0xff pattern:$0x73625140] }
  0x8d   :  { %1963 = vmatpush.bf16.msrb.mxu0 %v3373_v28  ;;  %v207_v28 = vld.sshfl [vmem:[#allocation1 + $0x8] sm:$0xff pattern:$0x73625140]  ;;  %v258_v17 = vpack.c.bf16 %v210_v13, %v210_v13 }
  0x8e   :  { %1976 = vmatpush.bf16.msrb.mxu1 %v3381_v29  ;;  %v209_v29 = vld.sshfl [vmem:[#allocation1 + $0x18] sm:$0xff pattern:$0x73625140]  ;;  %v255_v34 = vpack.c.bf16 %v207_v28, %v207_v28 }
  0x8f   :  { %1989 = vmatpush.bf16.msrb.mxu2 %v3389_v30  ;;  %v3458_v30 = vld [vmem:[#allocation5 + $0x5b8] sm:$0xff]  ;;  %v257_v35 = vpack.c.bf16 %v209_v29, %v209_v29 }
  0x90   :  { %2002 = vmatpush.bf16.msrb.mxu3 %v3397_v31  ;;  %v3466_v31 = vld [vmem:[#allocation5 + $0x5f8] sm:$0xff] }
  0x91   :  { %1964 = vmatpush.bf16.msrb.mxu0 %v3372_v32  ;;  %v254_v32 = vpack.c.bf16 %v206_v26, %v206_v26 }
  0x92   :  { %1977 = vmatpush.bf16.msrb.mxu1 %v3380_v33  ;;  %v256_v33 = vpack.c.bf16 %v208_v27, %v208_v27 }
  0x93   :  { %1990 = vmatpush.bf16.msrb.mxu2 %v3388_v37  ;;  %v3449_v37 = vld [vmem:[#allocation5 + $0x570] sm:$0xff] }
  0x94   :  { %2003 = vmatpush.bf16.msrb.mxu3 %v3396_v38  ;;  %v3457_v38 = vld [vmem:[#allocation5 + $0x5b0] sm:$0xff] }
  0x95   :  { %1965 = vmatpush.bf16.msrb.mxu0 %v3371_v40  ;;  %v3440_v40 = vld [vmem:[#allocation5 + $0x528] sm:$0xff] }
  0x96   :  { %1978 = vmatpush.bf16.msrb.mxu1 %v3379_v41  ;;  %v3448_v41 = vld [vmem:[#allocation5 + $0x568] sm:$0xff] }
  0x97   :  { %1991 = vmatpush.bf16.msrb.mxu2 %v3387_v42  ;;  %v3503_v42 = vld [vmem:[%s3765_s2] ss:$0 sm:$0xff] }
  0x98   :  { %2004 = vmatpush.bf16.msrb.mxu3 %v3395_v43  ;;  %1966 = vmatmul.bf16.vlgmr.msrb.gmra.mxu0 %v250_v52  ;;  %v3456_v43 = vld [vmem:[#allocation5 + $0x5a8] sm:$0xff] }
  0x99   :  { %2010 = vmatpush.bf16.msra.mxu0 %v3410_v44  ;;  %1979 = vmatmul.bf16.vlgmr.msrb.gmra.mxu1 %v251_v54  ;;  %v3464_v44 = vld [vmem:[#allocation5 + $0x5e8] sm:$0xff]  ;;  %v3446_v54 = vld [vmem:[#allocation5 + $0x558] sm:$0xff] }
  0x9a   :  { %2023 = vmatpush.bf16.msra.mxu1 %v3418_v45  ;;  %1992 = vmatmul.bf16.vlgmr.msrb.gmra.mxu2 %v252_v53  ;;  %v3438_v53 = vld [vmem:[#allocation5 + $0x518] sm:$0xff] }
  0x9b   :  { %2036 = vmatpush.bf16.msra.mxu2 %v3426_v50  ;;  %2005 = vmatmul.bf16.vlgmr.msrb.gmra.mxu3 %v253_v55  ;;  %v3455_v50 = vld [vmem:[#allocation5 + $0x5a0] sm:$0xff]  ;;  %v3454_v55 = vld [vmem:[#allocation5 + $0x598] sm:$0xff] }
  0x9c   :  { %2049 = vmatpush.bf16.msra.mxu3 %v3434_v51  ;;  %v3463_v51 = vld [vmem:[#allocation5 + $0x5e0] sm:$0xff] }
  0x9d   :  { %2011 = vmatpush.bf16.msra.mxu0 %v3409_v56  ;;  %v3462_v56 = vld [vmem:[#allocation5 + $0x5d8] sm:$0xff] }
  0x9e   :  { %2024 = vmatpush.bf16.msra.mxu1 %v3417_v57 }
  0x9f   :  { %2037 = vmatpush.bf16.msra.mxu2 %v3425_v58 }
  0xa0   :  { %2050 = vmatpush.bf16.msra.mxu3 %v3433_v59 }
  0xa1   :  { %2012 = vmatpush.bf16.msra.mxu0 %v3408_v60 }
  0xa2   :  { %2025 = vmatpush.bf16.msra.mxu1 %v3416_v61  ;;  %v3437_v61 = vld [vmem:[#allocation5 + $0x510] sm:$0xff] }
  0xa3   :  { %2038 = vmatpush.bf16.msra.mxu2 %v3424_v62  ;;  %v3445_v62 = vld [vmem:[#allocation5 + $0x550] sm:$0xff] }
  0xa4   :  { %2051 = vmatpush.bf16.msra.mxu3 %v3432_v63 }
  0xa5   :  { %2013 = vmatpush.bf16.msra.mxu0 %v3407_v0 }
  0xa6   :  { %2026 = vmatpush.bf16.msra.mxu1 %v3415_v1  ;;  %v3453_v1 = vld [vmem:[#allocation5 + $0x590] sm:$0xff] }
  0xa7   :  { %2039 = vmatpush.bf16.msra.mxu2 %v3423_v2  ;;  %v3461_v2 = vld [vmem:[#allocation5 + $0x5d0] sm:$0xff] }
  0xa8   :  { %2052 = vmatpush.bf16.msra.mxu3 %v3431_v3  ;;  %v3436_v3 = vld [vmem:[#allocation5 + $0x508] sm:$0xff] }
  0xa9   :  { %2014 = vmatpush.bf16.msra.mxu0 %v3406_v4  ;;  %v3444_v4 = vld [vmem:[#allocation5 + $0x548] sm:$0xff] }
  0xaa   :  { %2027 = vmatpush.bf16.msra.mxu1 %v3414_v5  ;;  %v3452_v5 = vld [vmem:[#allocation5 + $0x588] sm:$0xff] }
  0xab   :  { %2040 = vmatpush.bf16.msra.mxu2 %v3422_v6  ;;  %v3460_v6 = vld [vmem:[#allocation5 + $0x5c8] sm:$0xff] }
  0xac   :  { %2053 = vmatpush.bf16.msra.mxu3 %v3430_v7 }
  0xad   :  { %2015 = vmatpush.bf16.msra.mxu0 %v3405_v8  ;;  %v3435_v8 = vld [vmem:[#allocation5 + $0x500] sm:$0xff] }
  0xae   :  { %2028 = vmatpush.bf16.msra.mxu1 %v3413_v9 }
  0xaf   :  { %2041 = vmatpush.bf16.msra.mxu2 %v3421_v10  ;;  %v3443_v10 = vld [vmem:[#allocation5 + $0x540] sm:$0xff] }
  0xb0   :  { %2054 = vmatpush.bf16.msra.mxu3 %v3429_v11  ;;  %v3451_v11 = vld [vmem:[#allocation5 + $0x580] sm:$0xff] }
  0xb1   :  { %2016 = vmatpush.bf16.msra.mxu0 %v3404_v12  ;;  %v3459_v12 = vld [vmem:[#allocation5 + $0x5c0] sm:$0xff] }
  0xb2   :  { %2029 = vmatpush.bf16.msra.mxu1 %v3412_v15  ;;  %v212_v15 = vld.sshfl [vmem:[#allocation1 + $0x30] sm:$0xff pattern:$0x73625140] }
  0xb3   :  { %2042 = vmatpush.bf16.msra.mxu2 %v3420_v18  ;;  %v259_v18 = vpack.c.bf16 %v211_v14, %v211_v14  ;;  %v3479_v14 = vld [vmem:[#allocation8 + $0x20] sm:$0xff] }
  0xb4   :  { %2055 = vmatpush.bf16.msra.mxu3 %v3428_v19  ;;  %v260_v19 = vpack.c.bf16 %v212_v15, %v212_v15 }
  0xb5   :  { %2017 = vmatpush.bf16.msra.mxu0 %v3403_v20  ;;  %v1811_v45 = vpop.f32.mrf.mxu0  ;;  %v261_v20 = vpack.c.bf16 %v213_v16, %v213_v16  ;;  %v3478_v16 = vld [vmem:[#allocation8 + $0x18] sm:$0xff] }
  0xb6   :  { %2030 = vmatpush.bf16.msra.mxu1 %v3411_v21  ;;  %v1812_v48 = vadd.f32 %v3503_v42, %v1811_v45  ;;  %v1824_v49 = vpop.f32.mrf.mxu1 }
  0xb7   :  { %2043 = vmatpush.bf16.msra.mxu2 %v3419_v22 }
  0xb8   :  { %2056 = vmatpush.bf16.msra.mxu3 %v3427_v23  ;;  %2018 = vmatmul.bf16.vlgmr.msra.gmra.mxu0 %v254_v32  ;;  %v1825_v52 = vadd.f32 %v1824_v49, %v1812_v48  ;;  %v3474_v49 = vld [vmem:[#allocation7 + $0x38] sm:$0xff] }
  0xb9   :  { %2062 = vmatpush.bf16.msrb.mxu0 %v3442_v24  ;;  %2031 = vmatmul.bf16.vlgmr.msra.gmra.mxu1 %v255_v34 }
  0xba   :  { %2075 = vmatpush.bf16.msrb.mxu1 %v3450_v25  ;;  %2044 = vmatmul.bf16.vlgmr.msra.gmra.mxu2 %v256_v33 }
  0xbb   :  { %2088 = vmatpush.bf16.msrb.mxu2 %v3458_v30  ;;  %2057 = vmatmul.bf16.vlgmr.msra.gmra.mxu3 %v257_v35 }
  0xbc   :  { %2101 = vmatpush.bf16.msrb.mxu3 %v3466_v31 }
  0xbd   :  { %2063 = vmatpush.bf16.msrb.mxu0 %v3441_v36  ;;  %v1837_v57 = vpop.f32.mrf.mxu2  ;;  %v1813_v60 = vpop.f32.mrf.mxu0 }
  0xbe   :  { %2076 = vmatpush.bf16.msrb.mxu1 %v3449_v37  ;;  %v1838_v58 = vadd.f32 %v1837_v57, %v1825_v52  ;;  %v1850_v59 = vpop.f32.mrf.mxu3  ;;  %v1826_v0 = vpop.f32.mrf.mxu1  ;;  %v3473_v52 = vld [vmem:[#allocation7 + $0x30] sm:$0xff]  ;;  %v3470_v57 = vld [vmem:[#allocation7 + $0x18] sm:$0xff] }
  0xbf   :  { %2089 = vmatpush.bf16.msrb.mxu2 %v3457_v38 }
  0xc0   :  { %2102 = vmatpush.bf16.msrb.mxu3 %v3465_v39  ;;  %v1851_v63 = vadd.f32 %v1850_v59, %v1838_v58  ;;  %v3469_v59 = vld [vmem:[#allocation7 + $0x10] sm:$0xff] }
  0xc1   :  { %2064 = vmatpush.bf16.msrb.mxu0 %v3440_v40 }
  0xc2   :  { %2077 = vmatpush.bf16.msrb.mxu1 %v3448_v41 }
  0xc3   :  { %2090 = vmatpush.bf16.msrb.mxu2 %v3456_v43 }
  0xc4   :  { %2103 = vmatpush.bf16.msrb.mxu3 %v3464_v44 }
  0xc5   :  { %2065 = vmatpush.bf16.msrb.mxu0 %v3439_v46  ;;  %v1839_v7 = vpop.f32.mrf.mxu2 }
  0xc6   :  { %2078 = vmatpush.bf16.msrb.mxu1 %v3447_v47  ;;  %v1852_v9 = vpop.f32.mrf.mxu3 }
  0xc7   :  { %2091 = vmatpush.bf16.msrb.mxu2 %v3455_v50  ;;  %v3481_v9 = vld [vmem:[#allocation8 + $0x30] sm:$0xff] }
  0xc8   :  { %2104 = vmatpush.bf16.msrb.mxu3 %v3463_v51 }
  0xc9   :  { %2066 = vmatpush.bf16.msrb.mxu0 %v3438_v53  ;;  %v3472_v53 = vld [vmem:[#allocation7 + $0x28] sm:$0xff] }
  0xca   :  { %2079 = vmatpush.bf16.msrb.mxu1 %v3446_v54 }
  0xcb   :  { %2092 = vmatpush.bf16.msrb.mxu2 %v3454_v55 }
  0xcc   :  { %2105 = vmatpush.bf16.msrb.mxu3 %v3462_v56  ;;  %v3471_v56 = vld [vmem:[#allocation7 + $0x20] sm:$0xff] }
  0xcd   :  { %2067 = vmatpush.bf16.msrb.mxu0 %v3437_v61  ;;  %v3468_v61 = vld [vmem:[#allocation7 + $0x8] sm:$0xff] }
  0xce   :  { %2080 = vmatpush.bf16.msrb.mxu1 %v3445_v62 }
  0xcf   :  { %2093 = vmatpush.bf16.msrb.mxu2 %v3453_v1 }
  0xd0   :  { %2106 = vmatpush.bf16.msrb.mxu3 %v3461_v2  ;;  %v3467_v2 = vld [vmem:[#allocation7] sm:$0xff] }
  0xd1   :  { %2068 = vmatpush.bf16.msrb.mxu0 %v3436_v3 }
  0xd2   :  { %2081 = vmatpush.bf16.msrb.mxu1 %v3444_v4 }
  0xd3   :  { %2094 = vmatpush.bf16.msrb.mxu2 %v3452_v5 }
  0xd4   :  { %2107 = vmatpush.bf16.msrb.mxu3 %v3460_v6  ;;  %v3482_v6 = vld [vmem:[#allocation8 + $0x38] sm:$0xff] }
  0xd5   :  { %2069 = vmatpush.bf16.msrb.mxu0 %v3435_v8  ;;  %v1863_v21 = vpop.f32.mrf.mxu0 }
  0xd6   :  { %2082 = vmatpush.bf16.msrb.mxu1 %v3443_v10  ;;  %v1864_v22 = vadd.f32 %v1863_v21, %v1851_v63  ;;  %v1876_v23 = vpop.f32.mrf.mxu1  ;;  %v3477_v21 = vld [vmem:[#allocation8 + $0x10] sm:$0xff] }
  0xd7   :  { %2095 = vmatpush.bf16.msrb.mxu2 %v3451_v11 }
  0xd8   :  { %2108 = vmatpush.bf16.msrb.mxu3 %v3459_v12  ;;  %2070 = vmatmul.bf16.vlgmr.msrb.gmra.mxu0 %v258_v17  ;;  %v1877_v24 = vadd.f32 %v1876_v23, %v1864_v22  ;;  %v3480_v12 = vld [vmem:[#allocation8 + $0x28] sm:$0xff] }
  0xd9   :  { %2083 = vmatmul.bf16.vlgmr.msrb.gmra.mxu1 %v259_v18  ;;  %2184 = vmatpush.bf16.msra.mxu0 %v3474_v49  ;;  %v3505_v49 = vld [vmem:[%s3769_s6] ss:$0 sm:$0xff] }
  0xda   :  { %2096 = vmatmul.bf16.vlgmr.msrb.gmra.mxu2 %v260_v19  ;;  %2267 = vmatpush.bf16.msra.mxu1 %v3482_v6 }
  0xdb   :  { %2109 = vmatmul.bf16.vlgmr.msrb.gmra.mxu3 %v261_v20 }
  0xdd   :  { %v1889_v25 = vpop.f32.mrf.mxu2  ;;  %v1865_v28 = vpop.f32.mrf.mxu0  ;;  %2185 = vmatpush.bf16.msra.mxu0 %v3473_v52 }
  0xde   :  { %v1890_v26 = vadd.f32 %v1889_v25, %v1877_v24  ;;  %v1902_v27 = vpop.f32.mrf.mxu3  ;;  %v1878_v30 = vpop.f32.mrf.mxu1  ;;  %2268 = vmatpush.bf16.msra.mxu1 %v3481_v9 }
  0xe0   :  { %v1903_v29 = vadd.f32 %v1902_v27, %v1890_v26 }
  0xe1   :  { %2186 = vmatpush.bf16.msra.mxu0 %v3472_v53 }
  0xe2   :  { %2269 = vmatpush.bf16.msra.mxu1 %v3480_v12 }
  0xe5   :  { %v1891_v31 = vpop.f32.mrf.mxu2  ;;  %2187 = vmatpush.bf16.msra.mxu0 %v3471_v56 }
  0xe6   :  { %v1904_v32 = vpop.f32.mrf.mxu3  ;;  %2270 = vmatpush.bf16.msra.mxu1 %v3479_v14 }
  0xe9   :  { %2188 = vmatpush.bf16.msra.mxu0 %v3470_v57 }
  0xea   :  { %2271 = vmatpush.bf16.msra.mxu1 %v3478_v16 }
  0xed   :  { %2189 = vmatpush.bf16.msra.mxu0 %v3469_v59 }
  0xee   :  { %2272 = vmatpush.bf16.msra.mxu1 %v3477_v21 }
  0xf1   :  { %2190 = vmatpush.bf16.msra.mxu0 %v3468_v61 }
  0xf5   :  { %v1915_v33 = vpop.f32.mrf.mxu0  ;;  %2191 = vmatpush.bf16.msra.mxu0 %v3467_v2 }
  0xf6   :  { %v1916_v34 = vadd.f32 %v1915_v33, %v1903_v29  ;;  %v1928_v35 = vpop.f32.mrf.mxu1  ;;  %v3476_v33 = vld [vmem:[#allocation8 + $0x8] sm:$0xff] }
  0xf7   :  { %2273 = vmatpush.bf16.msra.mxu1 %v3476_v33 }
  0xf8   :  { %v1929_v36 = vadd.f32 %v1928_v35, %v1916_v34  ;;  %v3475_v34 = vld [vmem:[#allocation8] sm:$0xff]  ;;  %v3490_v35 = vld [vmem:[#allocation10 + $0x38] sm:$0xff] }
  0xf9   :  { %2350 = vmatpush.bf16.msra.mxu2 %v3490_v35 }
  0xfb   :  { %2274 = vmatpush.bf16.msra.mxu1 %v3475_v34 }
  0xfd   :  { %v1941_v37 = vpop.f32.mrf.mxu2  ;;  %v1917_v40 = vpop.f32.mrf.mxu0 }
  0xfe   :  { %v1942_v38 = vadd.f32 %v1941_v37, %v1929_v36  ;;  %v1954_v39 = vpop.f32.mrf.mxu3  ;;  %v1930_v42 = vpop.f32.mrf.mxu1  ;;  %v3489_v36 = vld [vmem:[#allocation10 + $0x30] sm:$0xff]  ;;  %v3488_v37 = vld [vmem:[#allocation10 + $0x28] sm:$0xff] }
  0xff   :  { %2351 = vmatpush.bf16.msra.mxu2 %v3489_v36  ;;  %v3485_v40 = vld [vmem:[#allocation10 + $0x10] sm:$0xff] }
 0x100   :  { %v1955_v41 = vadd.f32 %v1954_v39, %v1942_v38  ;;  %v3487_v38 = vld [vmem:[#allocation10 + $0x20] sm:$0xff]  ;;  %v3486_v39 = vld [vmem:[#allocation10 + $0x18] sm:$0xff] }
 0x103   :  { %2352 = vmatpush.bf16.msra.mxu2 %v3488_v37 }
 0x105   :  { %v1943_v43 = vpop.f32.mrf.mxu2 }
 0x106   :  { %v1956_v44 = vpop.f32.mrf.mxu3 }
 0x107   :  { %2353 = vmatpush.bf16.msra.mxu2 %v3487_v38 }
 0x10b   :  { %2354 = vmatpush.bf16.msra.mxu2 %v3486_v39 }
 0x10f   :  { %2355 = vmatpush.bf16.msra.mxu2 %v3485_v40 }
 0x115   :  { %v1967_v45 = vpop.f32.mrf.mxu0 }
 0x116   :  { %v1980_v46 = vpop.f32.mrf.mxu1  ;;  %v1968_v63 = vadd.f32 %v1967_v45, %v1955_v41  ;;  %v3504_v41 = vld [vmem:[%s3767_s4] ss:$0 sm:$0xff] }
 0x118   :  { %v1981_v4 = vadd.f32 %v1980_v46, %v1968_v63 }
 0x11d   :  { %v1993_v47 = vpop.f32.mrf.mxu2  ;;  %v1969_v50 = vpop.f32.mrf.mxu0 }
 0x11e   :  { %v2006_v48 = vpop.f32.mrf.mxu3  ;;  %v1982_v51 = vpop.f32.mrf.mxu1  ;;  %v1994_v5 = vadd.f32 %v1993_v47, %v1981_v4  ;;  %v3484_v47 = vld [vmem:[#allocation10 + $0x8] sm:$0xff] }
 0x11f   :  { %2356 = vmatpush.bf16.msra.mxu2 %v3484_v47 }
 0x120   :  { %v2007_v10 = vadd.f32 %v2006_v48, %v1994_v5  ;;  %v3483_v48 = vld [vmem:[#allocation10] sm:$0xff] }
 0x123   :  { %2357 = vmatpush.bf16.msra.mxu2 %v3483_v48 }
 0x125   :  { %v1995_v54 = vpop.f32.mrf.mxu2 }
 0x126   :  { %v2008_v55 = vpop.f32.mrf.mxu3 }
 0x127   :  { %v3506_v55 = vld [vmem:[%s3771_s8] ss:$0 sm:$0xff] }
 0x135   :  { %v2019_v58 = vpop.f32.mrf.mxu0 }
 0x136   :  { %v2032_v60 = vpop.f32.mrf.mxu1  ;;  %v2020_v11 = vadd.f32 %v2019_v58, %v2007_v10 }
 0x138   :  { %v2033_v13 = vadd.f32 %v2032_v60, %v2020_v11 }
 0x13d   :  { %v2045_v62 = vpop.f32.mrf.mxu2  ;;  %v2021_v1 = vpop.f32.mrf.mxu0 }
 0x13e   :  { %v2058_v0 = vpop.f32.mrf.mxu3  ;;  %v2034_v3 = vpop.f32.mrf.mxu1  ;;  %v2046_v15 = vadd.f32 %v2045_v62, %v2033_v13 }
 0x140   :  { %v2059_v17 = vadd.f32 %v2058_v0, %v2046_v15 }
 0x145   :  { %v2047_v7 = vpop.f32.mrf.mxu2 }
 0x146   :  { %v2060_v8 = vpop.f32.mrf.mxu3 }
 0x155   :  { %v2071_v18 = vpop.f32.mrf.mxu0 }
 0x156   :  { %v2084_v19 = vpop.f32.mrf.mxu1  ;;  %v2072_v20 = vadd.f32 %v2071_v18, %v2059_v17 }
 0x158   :  { %v2085_v22 = vadd.f32 %v2084_v19, %v2072_v20 }
 0x15d   :  { %v2097_v23 = vpop.f32.mrf.mxu2  ;;  %v2073_v26 = vpop.f32.mrf.mxu0 }
 0x15e   :  { %v2110_v24 = vpop.f32.mrf.mxu3  ;;  %v2098_v25 = vadd.f32 %v2097_v23, %v2085_v22  ;;  %v2086_v27 = vpop.f32.mrf.mxu1 }
 0x160   :  { %v2111_v28 = vadd.f32 %v2110_v24, %v2098_v25 }
 0x162   :  { %v2114_v29 = vmax.f32 %v2111_v28, 0.0 }
 0x164   :  { %v2115_v30 = vpack.c.bf16 %v2114_v29, %v2114_v29 }
 0x165   :  { %v2099_v31 = vpop.f32.mrf.mxu2 }
 0x166   :  { %v2112_v32 = vpop.f32.mrf.mxu3  ;;  %2192 = vmatmul.bf16.vlgmr.msra.gmra.mxu0 %v2115_v30 }
 0x1e3   :  { %v2193_v42 = vpop.f32.mrf.mxu0 }
 0x1e4   :  { %v2194_v43 = vadd.f32 %v3504_v41, %v2193_v42 }
 0x1e6   :  { %v2197_v44 = vmax.f32 %v2194_v43, 0.0 }
 0x1e8   :  { %v2198_v45 = vpack.c.bf16 %v2197_v44, %v2197_v44 }
 0x1ea   :  { %2275 = vmatmul.bf16.vlgmr.msra.gmra.mxu1 %v2198_v45 }
 0x1eb   :  { %v2195_v46 = vpop.f32.mrf.mxu0 }
 0x267   :  { %v2276_v50 = vpop.f32.mrf.mxu1 }
 0x268   :  { %v2277_v51 = vadd.f32 %v3505_v49, %v2276_v50 }
 0x26a   :  { %v2280_v52 = vmax.f32 %v2277_v51, 0.0 }
 0x26c   :  { %v2281_v53 = vpack.c.bf16 %v2280_v52, %v2280_v52 }
 0x26e   :  { %2358 = vmatmul.bf16.vlgmr.msra.gmra.mxu2 %v2281_v53 }
 0x26f   :  { %v2278_v54 = vpop.f32.mrf.mxu1 }
 0x2f1   :  { %v2359_v56 = vpop.f32.mrf.mxu2 }
 0x2f2   :  { %v2360_v57 = vadd.f32 %v3506_v55, %v2359_v56 }
 0x2f4   :  { %v2363_v58 = vpack.c.bf16 %v2360_v57, %v2360_v57 }
 0x2f6   :  { %v2365_v59 = vrot.slane %v2363_v58, 3 }
 0x2f8   :  { %v2369_v60 = vsel %vm2366_vm0, %v2363_v58, %v2365_v59  ;;  %v2371_v61 = vsel %vm2370_vm1, %v2363_v58, %v2365_v59  ;;  %v2375_v62 = vsel %vm2374_vm2, %v2363_v58, %v2365_v59  ;;  %v2379_v63 = vsel %vm2378_vm3, %v2363_v58, %v2365_v59 }
 0x2f9   :  { %v2373_v0 = vrot.slane %v2371_v61, 1  ;;  %v2377_v1 = vrot.slane %v2375_v62, 2  ;;  %v2381_v2 = vrot.slane %v2379_v63, 3  ;;  %2386 = vst [vmem:[#allocation11] sm:$0x1] %v2369_v60  ;;  %v2361_v3 = vpop.f32.mrf.mxu2 }
 0x2fb   :  { %2387 = vst [vmem:[#allocation11 + $0x1] sm:$0x1] %v2373_v0 }
 0x2fc   :  { %2388 = vst [vmem:[#allocation11 + $0x2] sm:$0x1] %v2377_v1 }
 0x2fd   :  { %2389 = vst [vmem:[#allocation11 + $0x3] sm:$0x1] %v2381_v2 }
 0x2fe   :  { %2393 = vsyncadd [#allocation4], 48  ;;  %s2396_s18 = sshll.u32 %s3772_s9, 4  ;;  %s3668_s19 = smov [#allocation11]   ;;  %s2397_s18 = int_to_ptr.hbm [resolvable:$true] %s2396_s18 }
 0x2ff   :  { %s2394_s20 = sshll.u32 %s3668_s19, 4  ;;  %s3669_s21 = smov 16   ;;  %s2395_s20 = int_to_ptr.vmem [resolvable:$true] %s2394_s20 }
 0x300   :  { %s3670_s1 = smov 1  }
 0x301   :  { %2402 = dma.vmem_to_hbm [thread:$0]  %s2395_s20, 16, %s2397_s18, [#allocation4], %s3669_s21, %s3669_s21, %s3670_s1  }
 0x302   :  { %3657 = dma.done.wait [#allocation4], 64  }
 0x303   :  { %3658 = vsyncadd [#allocation4], 4294967232 }
 0x304   :  { %2407 = vsyncpa [#allocation3], 1 }
 0x305   :  { %2408 = vsyncpa [#allocation6], 1 }
 0x306   :  { %2409 = vsyncpa [#allocation9], 1 }
 0x307   :  { %2410 = vsyncpa [#allocation4], 1 }

</bundles_post_ra>
